<compile_context>
chip_gen: v7x
topology: tpu7x:2x2x1
jax: 0.10.0
libtpu: 0.0.40
codegen_flags: <defaults>
</compile_context>

<pallas_src>
import functools
import math

import jax
import jax.numpy as jnp
from jax import lax
from jax.experimental import pallas as pl
from jax.experimental.pallas import tpu as pltpu

_LANE = 128  # TPU lane width (v5e / v6e / v7x)


def _pick_block_b(batch, seq, target_rows=256, max_rows=1024):
    """Batch rows packed per grid step.

    Smallest divisor of `batch` whose packed row count (block_b * seq) reaches
    `target_rows` (fills the MXU's rows), capped at `max_rows` to bound VMEM.
    """
    best = 1
    for d in range(1, batch + 1):
        if batch % d:
            continue
        if d * seq <= max_rows:
            best = d
            if d * seq >= target_rows:
                break
        else:
            break
    return best


def _vmem_limit_bytes(block_b, seq, d_in, num_heads, d_pad, itemsize):
    """Conservative scoped-VMEM budget, clamped to fit v7x's 64 MiB VMEM."""
    rows = block_b * seq
    slab = d_in * num_heads * d_pad * itemsize
    weights = 3 * 2 * slab                                  # assume 2 buffers
    xio = 2 * rows * (d_in + num_heads * d_pad) * itemsize  # x/out, 2 buffers
    qkv = 3 * rows * num_heads * d_pad * 4                  # f32 projections
    scores = 4 * seq * seq * 4                              # live score tiles
    est = weights + xio + qkv + scores
    return int(min(max(2 * est, 32 * 1024 * 1024), 56 * 1024 * 1024))


def _mha_kernel(x_ref, wq_ref, wk_ref, wv_ref, o_ref, *, num_heads, seq_len):
    # x_ref:  (Bb*T, d_in)      packed batch rows of this grid step
    # w*_ref: (d_in, H*Dp)      all heads' projections, 128-lane aligned blocks
    # o_ref:  (Bb*T, H*Dp)      final concatenated-head layout (lane-dense)
    rows, d_in = x_ref.shape
    blk_b = rows // seq_len
    d_pad = wq_ref.shape[1] // num_heads

    # One lane-dense projection per Q/K/V covering every head and every packed
    # batch row (MXU, f32 accumulation).  1/sqrt(d_out) is pre-folded into Wq.
    x2 = x_ref[...]
    q = jnp.dot(x2, wq_ref[...], preferred_element_type=jnp.float32)
    k = jnp.dot(x2, wk_ref[...], preferred_element_type=jnp.float32)
    v = jnp.dot(x2, wv_ref[...], preferred_element_type=jnp.float32)

    dt = x_ref.dtype  # compute dtype for the attention matmuls (bf16 on v6e/v7x)
    q = q.astype(dt)
    k = k.astype(dt)
    v = v.astype(dt)

    # Causal keep-mask, shared by every (batch row, head).
    row = lax.broadcasted_iota(jnp.int32, (seq_len, seq_len), 0)
    col = lax.broadcasted_iota(jnp.int32, (seq_len, seq_len), 1)
    keep = col <= row
    neg_inf = jnp.float32(-jnp.inf)

    # Bb and H are small and static -> unrolled at trace time.  Every slice
    # below is aligned to (8, 128) vreg tiles (row offsets are multiples of T,
    # column offsets multiples of 128), so no XLU relayout copies.
    # TODO(synk): for long sequences, replace this unroll with a KV grid axis
    # and online softmax (flash) to bound the (T, T) live set.
    for b in range(blk_b):
        r0 = b * seq_len
        for h in range(num_heads):
            c0 = h * d_pad
            qh = q[r0:r0 + seq_len, c0:c0 + d_pad]
            kh = k[r0:r0 + seq_len, c0:c0 + d_pad]
            vh = v[r0:r0 + seq_len, c0:c0 + d_pad]

            # Contract the feature dims directly (no k.T / XLU transpose).
            s = lax.dot_general(qh, kh, (((1,), (1,)), ((), ())),
                                preferred_element_type=jnp.float32)
            s = jnp.where(keep, s, neg_inf)

            # numerically stable softmax along keys
            m = jnp.max(s, axis=-1, keepdims=True)
            p = jnp.exp(s - m)
            denom = jnp.sum(p, axis=-1, keepdims=True)
            attn = p * pl.reciprocal(denom, approx=True)  # EUP vrcp slot

            # TODO(synk): nn.Dropout on attention weights is identity at
            # inference; no RNG dropout is applied here.
            ctx = jnp.dot(attn.astype(dt), vh,
                          preferred_element_type=jnp.float32)

            # Write this head's context straight into its 128-aligned column
            # block of the output (no concatenate / extra VMEM temp).
            o_ref[r0:r0 + seq_len, c0:c0 + d_pad] = ctx.astype(o_ref.dtype)


def multi_head_attention_wrapper(x, wq, wk, wv, *, compute_dtype=None,
                                 block_b=None):
    """x: (B, T, d_in); wq/wk/wv: (H, d_in, d_out). Returns (B, T, H*d_out)."""
    B, T, d_in = x.shape
    H, _, d_out = wq.shape

    d_pad = ((d_out + _LANE - 1) // _LANE) * _LANE
    scale = 1.0 / math.sqrt(d_out)  # torch: scores / keys.shape[-1]**0.5

    def stack(w, col_scale=1.0):
        # (H, d_in, d_out) -> (d_in, H*Dp): heads lane-contiguous, each head's
        # column block zero-padded to a 128-lane boundary.  One-time reshuffle.
        w = jnp.transpose(w, (1, 0, 2)) * jnp.asarray(col_scale, w.dtype)
        if d_pad != d_out:
            w = jnp.pad(w, ((0, 0), (0, 0), (0, d_pad - d_out)))
        return w.reshape(d_in, H * d_pad)

    wq_s = stack(wq, scale)  # fold the 1/sqrt(d_out) scale into W_q
    wk_s = stack(wk)
    wv_s = stack(wv)

    out_dtype = x.dtype
    if compute_dtype is not None:
        x = x.astype(compute_dtype)
        wq_s = wq_s.astype(compute_dtype)
        wk_s = wk_s.astype(compute_dtype)
        wv_s = wv_s.astype(compute_dtype)

    if block_b is None:
        block_b = _pick_block_b(B, T)
    assert B % block_b == 0, "block_b must divide the batch size"
    rows = block_b * T

    # Present x / out as 2-D lane-dense slabs (free row-major reshapes in XLA).
    x2d = x.reshape(B * T, d_in)

    kernel = functools.partial(_mha_kernel, num_heads=H, seq_len=T)

    out2d = pl.pallas_call(
        kernel,
        out_shape=jax.ShapeDtypeStruct((B * T, H * d_pad), out_dtype),
        grid_spec=pltpu.PrefetchScalarGridSpec(
            num_scalar_prefetch=0,
            grid=(B // block_b,),
            in_specs=[
                pl.BlockSpec((rows, d_in), lambda b: (b, 0)),
                # weight slabs are grid-invariant -> loaded once, kept resident
                pl.BlockSpec((d_in, H * d_pad), lambda b: (0, 0)),
                pl.BlockSpec((d_in, H * d_pad), lambda b: (0, 0)),
                pl.BlockSpec((d_in, H * d_pad), lambda b: (0, 0)),
            ],
            out_specs=pl.BlockSpec((rows, H * d_pad), lambda b: (b, 0)),
        ),
        compiler_params=pltpu.CompilerParams(
            dimension_semantics=("parallel",),  # shard batch blocks across TCs
            vmem_limit_bytes=_vmem_limit_bytes(
                block_b, T, d_in, H, d_pad, x.dtype.itemsize),
        ),
    )(x2d, wq_s, wk_s, wv_s)

    if d_pad == d_out:
        return out2d.reshape(B, T, H * d_out)
    # Strip the per-head lane padding (layout plumbing, not compute).
    return (out2d.reshape(B, T, H, d_pad)[..., :d_out]
            .reshape(B, T, H * d_out))


def _reference(x, wq, wk, wv):
    B, T, d_in = x.shape
    H, _, d_out = wq.shape
    q = jnp.einsum("btd,hde->bhte", x, wq)
    k = jnp.einsum("btd,hde->bhte", x, wk)
    v = jnp.einsum("btd,hde->bhte", x, wv)
    s = jnp.einsum("bhqe,bhke->bhqk", q, k) / math.sqrt(d_out)
    mask = jnp.triu(jnp.ones((T, T), dtype=bool), k=1)
    s = jnp.where(mask, -jnp.inf, s)
    w = jax.nn.softmax(s, axis=-1)
    ctx = jnp.einsum("bhqk,bhke->bhqe", w, v)
    return jnp.transpose(ctx, (0, 2, 1, 3)).reshape(B, T, H * d_out)


if __name__ == "__main__":
    # Small shapes consistent with the module's forward.
    B, T, d_in, d_out, H = 2, 8, 32, 16, 4

    key = jax.random.PRNGKey(0)
    kx, kq, kk, kv = jax.random.split(key, 4)
    x = jax.random.normal(kx, (B, T, d_in), dtype=jnp.float32)
    # Deterministic "nn.Linear(d_in, d_out, bias=False)" weights per head.
    # PyTorch stores weight as (d_out, d_in) and applies x @ W.T; we store the
    # transposed (d_in, d_out) form directly.
    scale = 1.0 / math.sqrt(d_in)
    wq = jax.random.uniform(kq, (H, d_in, d_out), jnp.float32, -scale, scale)
    wk = jax.random.uniform(kk, (H, d_in, d_out), jnp.float32, -scale, scale)
    wv = jax.random.uniform(kv, (H, d_in, d_out), jnp.float32, -scale, scale)

    ref = _reference(x, wq, wk, wv)

    # Full-precision path (correctness check; tolerance leaves headroom for the
    # EUP approximate reciprocal in the softmax normalization).
    out = multi_head_attention_wrapper(x, wq, wk, wv)
    out = jax.block_until_ready(out)
    assert out.shape == (B, T, H * d_out)
    assert jnp.allclose(out, ref, atol=5e-3, rtol=5e-3), "mismatch vs reference"

    # bf16 MXU-feed path (v6e/v7x perf mode): operands cast at the boundary,
    # f32 accumulation kept; looser tolerance for bf16 rounding.
    out_bf16 = multi_head_attention_wrapper(x, wq, wk, wv,
                                            compute_dtype=jnp.bfloat16)
    out_bf16 = jax.block_until_ready(out_bf16)
    assert out_bf16.shape == (B, T, H * d_out)
    assert jnp.allclose(out_bf16.astype(jnp.float32), ref,
                        atol=1e-1, rtol=1e-1), "bf16 path mismatch"

    print("KERNEL_OK")
</pallas_src>

<mosaic_0001>
module attributes {stable_mosaic.version = 11 : i64} {
  func.func @_mha_kernel(%arg0: i32, %arg1: memref<16x32xf32, #tpu.memory_space<vmem>>, %arg2: memref<32x512xf32, #tpu.memory_space<vmem>>, %arg3: memref<32x512xf32, #tpu.memory_space<vmem>>, %arg4: memref<32x512xf32, #tpu.memory_space<vmem>>, %arg5: memref<16x512xf32, #tpu.memory_space<vmem>>) attributes {dimension_semantics = [#tpu.dimension_semantics<parallel>], iteration_bounds = array<i64: 1>, scalar_prefetch = 0 : i64, scratch_operands = 0 : i64, tpu.core_type = #tpu.core_type<tc>, window_params = [{transform_indices = @transform_0, window_bounds = array<i64: 16, 32>}, {pipeline_mode = #tpu.pipeline_mode<synchronous>, transform_indices = @transform_1, window_bounds = array<i64: 32, 512>}, {pipeline_mode = #tpu.pipeline_mode<synchronous>, transform_indices = @transform_2, window_bounds = array<i64: 32, 512>}, {pipeline_mode = #tpu.pipeline_mode<synchronous>, transform_indices = @transform_3, window_bounds = array<i64: 32, 512>}, {transform_indices = @transform_4, window_bounds = array<i64: 16, 512>}]} {
    %c0 = arith.constant 0 : index
    %c0_0 = arith.constant 0 : index
    %0 = vector.load %arg1[%c0, %c0_0] : memref<16x32xf32, #tpu.memory_space<vmem>>, vector<16x32xf32>
    %c0_1 = arith.constant 0 : index
    %c0_2 = arith.constant 0 : index
    %1 = vector.load %arg2[%c0_1, %c0_2] : memref<32x512xf32, #tpu.memory_space<vmem>>, vector<32x512xf32>
    %cst = arith.constant dense<0.000000e+00> : vector<16x512xf32>
    %2 = tpu.matmul %0, %1, %cst {dimension_numbers = #tpu.dot_dimension_numbers<[1], [0], [0], [1], [0, 0, 1, 1], [], []>} : vector<16x32xf32>, vector<32x512xf32>, vector<16x512xf32> -> vector<16x512xf32>
    %c0_3 = arith.constant 0 : index
    %c0_4 = arith.constant 0 : index
    %3 = vector.load %arg3[%c0_3, %c0_4] : memref<32x512xf32, #tpu.memory_space<vmem>>, vector<32x512xf32>
    %cst_5 = arith.constant dense<0.000000e+00> : vector<16x512xf32>
    %4 = tpu.matmul %0, %3, %cst_5 {dimension_numbers = #tpu.dot_dimension_numbers<[1], [0], [0], [1], [0, 0, 1, 1], [], []>} : vector<16x32xf32>, vector<32x512xf32>, vector<16x512xf32> -> vector<16x512xf32>
    %c0_6 = arith.constant 0 : index
    %c0_7 = arith.constant 0 : index
    %5 = vector.load %arg4[%c0_6, %c0_7] : memref<32x512xf32, #tpu.memory_space<vmem>>, vector<32x512xf32>
    %cst_8 = arith.constant dense<0.000000e+00> : vector<16x512xf32>
    %6 = tpu.matmul %0, %5, %cst_8 {dimension_numbers = #tpu.dot_dimension_numbers<[1], [0], [0], [1], [0, 0, 1, 1], [], []>} : vector<16x32xf32>, vector<32x512xf32>, vector<16x512xf32> -> vector<16x512xf32>
    %7 = tpu.iota {dimensions = array<i32: 0>} : vector<8x8xi32>
    %8 = tpu.iota {dimensions = array<i32: 1>} : vector<8x8xi32>
    %9 = arith.cmpi sle, %8, %7 : vector<8x8xi32>
    %10 = vector.extract_strided_slice %2 {offsets = [0, 0], sizes = [8, 128], strides = [1, 1]} : vector<16x512xf32> to vector<8x128xf32>
    %11 = vector.extract_strided_slice %4 {offsets = [0, 0], sizes = [8, 128], strides = [1, 1]} : vector<16x512xf32> to vector<8x128xf32>
    %12 = vector.extract_strided_slice %6 {offsets = [0, 0], sizes = [8, 128], strides = [1, 1]} : vector<16x512xf32> to vector<8x128xf32>
    %cst_9 = arith.constant dense<0.000000e+00> : vector<8x8xf32>
    %13 = tpu.matmul %10, %11, %cst_9 {dimension_numbers = #tpu.dot_dimension_numbers<[1], [1], [0], [0], [0, 0, 1, 0], [], []>} : vector<8x128xf32>, vector<8x128xf32>, vector<8x8xf32> -> vector<8x8xf32>
    %cst_10 = arith.constant 0xFF800000 : f32
    %14 = vector.broadcast %cst_10 : f32 to vector<8x8xf32>
    %15 = arith.select %9, %13, %14 : vector<8x8xi1>, vector<8x8xf32>
    %cst_11 = arith.constant dense<0xFF800000> : vector<8xf32>
    %16 = vector.multi_reduction <maximumf>, %15, %cst_11 [1] : vector<8x8xf32> to vector<8xf32>
    %17 = vector.shape_cast %16 : vector<8xf32> to vector<8x1xf32>
    %18 = vector.broadcast %17 : vector<8x1xf32> to vector<8x8xf32>
    %19 = arith.subf %15, %18 : vector<8x8xf32>
    %20 = math.exp %19 : vector<8x8xf32>
    %cst_12 = arith.constant dense<0.000000e+00> : vector<8xf32>
    %21 = vector.multi_reduction <add>, %20, %cst_12 [1] : vector<8x8xf32> to vector<8xf32>
    %22 = vector.shape_cast %21 : vector<8xf32> to vector<8x1xf32>
    %23 = tpu.reciprocal %22 {approx = true} : vector<8x1xf32> -> vector<8x1xf32>
    %24 = vector.broadcast %23 : vector<8x1xf32> to vector<8x8xf32>
    %25 = arith.mulf %20, %24 : vector<8x8xf32>
    %cst_13 = arith.constant dense<0.000000e+00> : vector<8x128xf32>
    %26 = tpu.matmul %25, %12, %cst_13 {dimension_numbers = #tpu.dot_dimension_numbers<[1], [0], [0], [1], [0, 0, 1, 1], [], []>} : vector<8x8xf32>, vector<8x128xf32>, vector<8x128xf32> -> vector<8x128xf32>
    %c0_14 = arith.constant 0 : index
    %c0_15 = arith.constant 0 : index
    %27 = vector.load %arg5[%c0_14, %c0_15] : memref<16x512xf32, #tpu.memory_space<vmem>>, vector<8x128xf32>
    tpu.vector_store %arg5[%c0_14, %c0_15], %26 {strides = array<i32>} : memref<16x512xf32, #tpu.memory_space<vmem>>, vector<8x128xf32>,
    %28 = vector.extract_strided_slice %2 {offsets = [0, 128], sizes = [8, 128], strides = [1, 1]} : vector<16x512xf32> to vector<8x128xf32>
    %29 = vector.extract_strided_slice %4 {offsets = [0, 128], sizes = [8, 128], strides = [1, 1]} : vector<16x512xf32> to vector<8x128xf32>
    %30 = vector.extract_strided_slice %6 {offsets = [0, 128], sizes = [8, 128], strides = [1, 1]} : vector<16x512xf32> to vector<8x128xf32>
    %cst_16 = arith.constant dense<0.000000e+00> : vector<8x8xf32>
    %31 = tpu.matmul %28, %29, %cst_16 {dimension_numbers = #tpu.dot_dimension_numbers<[1], [1], [0], [0], [0, 0, 1, 0], [], []>} : vector<8x128xf32>, vector<8x128xf32>, vector<8x8xf32> -> vector<8x8xf32>
    %cst_17 = arith.constant 0xFF800000 : f32
    %32 = vector.broadcast %cst_17 : f32 to vector<8x8xf32>
    %33 = arith.select %9, %31, %32 : vector<8x8xi1>, vector<8x8xf32>
    %cst_18 = arith.constant dense<0xFF800000> : vector<8xf32>
    %34 = vector.multi_reduction <maximumf>, %33, %cst_18 [1] : vector<8x8xf32> to vector<8xf32>
    %35 = vector.shape_cast %34 : vector<8xf32> to vector<8x1xf32>
    %36 = vector.broadcast %35 : vector<8x1xf32> to vector<8x8xf32>
    %37 = arith.subf %33, %36 : vector<8x8xf32>
    %38 = math.exp %37 : vector<8x8xf32>
    %cst_19 = arith.constant dense<0.000000e+00> : vector<8xf32>
    %39 = vector.multi_reduction <add>, %38, %cst_19 [1] : vector<8x8xf32> to vector<8xf32>
    %40 = vector.shape_cast %39 : vector<8xf32> to vector<8x1xf32>
    %41 = tpu.reciprocal %40 {approx = true} : vector<8x1xf32> -> vector<8x1xf32>
    %42 = vector.broadcast %41 : vector<8x1xf32> to vector<8x8xf32>
    %43 = arith.mulf %38, %42 : vector<8x8xf32>
    %cst_20 = arith.constant dense<0.000000e+00> : vector<8x128xf32>
    %44 = tpu.matmul %43, %30, %cst_20 {dimension_numbers = #tpu.dot_dimension_numbers<[1], [0], [0], [1], [0, 0, 1, 1], [], []>} : vector<8x8xf32>, vector<8x128xf32>, vector<8x128xf32> -> vector<8x128xf32>
    %c0_21 = arith.constant 0 : index
    %c128 = arith.constant 128 : index
    %45 = vector.load %arg5[%c0_21, %c128] : memref<16x512xf32, #tpu.memory_space<vmem>>, vector<8x128xf32>
    tpu.vector_store %arg5[%c0_21, %c128], %44 {strides = array<i32>} : memref<16x512xf32, #tpu.memory_space<vmem>>, vector<8x128xf32>,
    %46 = vector.extract_strided_slice %2 {offsets = [0, 256], sizes = [8, 128], strides = [1, 1]} : vector<16x512xf32> to vector<8x128xf32>
    %47 = vector.extract_strided_slice %4 {offsets = [0, 256], sizes = [8, 128], strides = [1, 1]} : vector<16x512xf32> to vector<8x128xf32>
    %48 = vector.extract_strided_slice %6 {offsets = [0, 256], sizes = [8, 128], strides = [1, 1]} : vector<16x512xf32> to vector<8x128xf32>
    %cst_22 = arith.constant dense<0.000000e+00> : vector<8x8xf32>
    %49 = tpu.matmul %46, %47, %cst_22 {dimension_numbers = #tpu.dot_dimension_numbers<[1], [1], [0], [0], [0, 0, 1, 0], [], []>} : vector<8x128xf32>, vector<8x128xf32>, vector<8x8xf32> -> vector<8x8xf32>
    %cst_23 = arith.constant 0xFF800000 : f32
    %50 = vector.broadcast %cst_23 : f32 to vector<8x8xf32>
    %51 = arith.select %9, %49, %50 : vector<8x8xi1>, vector<8x8xf32>
    %cst_24 = arith.constant dense<0xFF800000> : vector<8xf32>
    %52 = vector.multi_reduction <maximumf>, %51, %cst_24 [1] : vector<8x8xf32> to vector<8xf32>
    %53 = vector.shape_cast %52 : vector<8xf32> to vector<8x1xf32>
    %54 = vector.broadcast %53 : vector<8x1xf32> to vector<8x8xf32>
    %55 = arith.subf %51, %54 : vector<8x8xf32>
    %56 = math.exp %55 : vector<8x8xf32>
    %cst_25 = arith.constant dense<0.000000e+00> : vector<8xf32>
    %57 = vector.multi_reduction <add>, %56, %cst_25 [1] : vector<8x8xf32> to vector<8xf32>
    %58 = vector.shape_cast %57 : vector<8xf32> to vector<8x1xf32>
    %59 = tpu.reciprocal %58 {approx = true} : vector<8x1xf32> -> vector<8x1xf32>
    %60 = vector.broadcast %59 : vector<8x1xf32> to vector<8x8xf32>
    %61 = arith.mulf %56, %60 : vector<8x8xf32>
    %cst_26 = arith.constant dense<0.000000e+00> : vector<8x128xf32>
    %62 = tpu.matmul %61, %48, %cst_26 {dimension_numbers = #tpu.dot_dimension_numbers<[1], [0], [0], [1], [0, 0, 1, 1], [], []>} : vector<8x8xf32>, vector<8x128xf32>, vector<8x128xf32> -> vector<8x128xf32>
    %c0_27 = arith.constant 0 : index
    %c256 = arith.constant 256 : index
    %63 = vector.load %arg5[%c0_27, %c256] : memref<16x512xf32, #tpu.memory_space<vmem>>, vector<8x128xf32>
    tpu.vector_store %arg5[%c0_27, %c256], %62 {strides = array<i32>} : memref<16x512xf32, #tpu.memory_space<vmem>>, vector<8x128xf32>,
    %64 = vector.extract_strided_slice %2 {offsets = [0, 384], sizes = [8, 128], strides = [1, 1]} : vector<16x512xf32> to vector<8x128xf32>
    %65 = vector.extract_strided_slice %4 {offsets = [0, 384], sizes = [8, 128], strides = [1, 1]} : vector<16x512xf32> to vector<8x128xf32>
    %66 = vector.extract_strided_slice %6 {offsets = [0, 384], sizes = [8, 128], strides = [1, 1]} : vector<16x512xf32> to vector<8x128xf32>
    %cst_28 = arith.constant dense<0.000000e+00> : vector<8x8xf32>
    %67 = tpu.matmul %64, %65, %cst_28 {dimension_numbers = #tpu.dot_dimension_numbers<[1], [1], [0], [0], [0, 0, 1, 0], [], []>} : vector<8x128xf32>, vector<8x128xf32>, vector<8x8xf32> -> vector<8x8xf32>
    %cst_29 = arith.constant 0xFF800000 : f32
    %68 = vector.broadcast %cst_29 : f32 to vector<8x8xf32>
    %69 = arith.select %9, %67, %68 : vector<8x8xi1>, vector<8x8xf32>
    %cst_30 = arith.constant dense<0xFF800000> : vector<8xf32>
    %70 = vector.multi_reduction <maximumf>, %69, %cst_30 [1] : vector<8x8xf32> to vector<8xf32>
    %71 = vector.shape_cast %70 : vector<8xf32> to vector<8x1xf32>
    %72 = vector.broadcast %71 : vector<8x1xf32> to vector<8x8xf32>
    %73 = arith.subf %69, %72 : vector<8x8xf32>
    %74 = math.exp %73 : vector<8x8xf32>
    %cst_31 = arith.constant dense<0.000000e+00> : vector<8xf32>
    %75 = vector.multi_reduction <add>, %74, %cst_31 [1] : vector<8x8xf32> to vector<8xf32>
    %76 = vector.shape_cast %75 : vector<8xf32> to vector<8x1xf32>
    %77 = tpu.reciprocal %76 {approx = true} : vector<8x1xf32> -> vector<8x1xf32>
    %78 = vector.broadcast %77 : vector<8x1xf32> to vector<8x8xf32>
    %79 = arith.mulf %74, %78 : vector<8x8xf32>
    %cst_32 = arith.constant dense<0.000000e+00> : vector<8x128xf32>
    %80 = tpu.matmul %79, %66, %cst_32 {dimension_numbers = #tpu.dot_dimension_numbers<[1], [0], [0], [1], [0, 0, 1, 1], [], []>} : vector<8x8xf32>, vector<8x128xf32>, vector<8x128xf32> -> vector<8x128xf32>
    %c0_33 = arith.constant 0 : index
    %c384 = arith.constant 384 : index
    %81 = vector.load %arg5[%c0_33, %c384] : memref<16x512xf32, #tpu.memory_space<vmem>>, vector<8x128xf32>
    tpu.vector_store %arg5[%c0_33, %c384], %80 {strides = array<i32>} : memref<16x512xf32, #tpu.memory_space<vmem>>, vector<8x128xf32>,
    %82 = vector.extract_strided_slice %2 {offsets = [8, 0], sizes = [8, 128], strides = [1, 1]} : vector<16x512xf32> to vector<8x128xf32>
    %83 = vector.extract_strided_slice %4 {offsets = [8, 0], sizes = [8, 128], strides = [1, 1]} : vector<16x512xf32> to vector<8x128xf32>
    %84 = vector.extract_strided_slice %6 {offsets = [8, 0], sizes = [8, 128], strides = [1, 1]} : vector<16x512xf32> to vector<8x128xf32>
    %cst_34 = arith.constant dense<0.000000e+00> : vector<8x8xf32>
    %85 = tpu.matmul %82, %83, %cst_34 {dimension_numbers = #tpu.dot_dimension_numbers<[1], [1], [0], [0], [0, 0, 1, 0], [], []>} : vector<8x128xf32>, vector<8x128xf32>, vector<8x8xf32> -> vector<8x8xf32>
    %cst_35 = arith.constant 0xFF800000 : f32
    %86 = vector.broadcast %cst_35 : f32 to vector<8x8xf32>
    %87 = arith.select %9, %85, %86 : vector<8x8xi1>, vector<8x8xf32>
    %cst_36 = arith.constant dense<0xFF800000> : vector<8xf32>
    %88 = vector.multi_reduction <maximumf>, %87, %cst_36 [1] : vector<8x8xf32> to vector<8xf32>
    %89 = vector.shape_cast %88 : vector<8xf32> to vector<8x1xf32>
    %90 = vector.broadcast %89 : vector<8x1xf32> to vector<8x8xf32>
    %91 = arith.subf %87, %90 : vector<8x8xf32>
    %92 = math.exp %91 : vector<8x8xf32>
    %cst_37 = arith.constant dense<0.000000e+00> : vector<8xf32>
    %93 = vector.multi_reduction <add>, %92, %cst_37 [1] : vector<8x8xf32> to vector<8xf32>
    %94 = vector.shape_cast %93 : vector<8xf32> to vector<8x1xf32>
    %95 = tpu.reciprocal %94 {approx = true} : vector<8x1xf32> -> vector<8x1xf32>
    %96 = vector.broadcast %95 : vector<8x1xf32> to vector<8x8xf32>
    %97 = arith.mulf %92, %96 : vector<8x8xf32>
    %cst_38 = arith.constant dense<0.000000e+00> : vector<8x128xf32>
    %98 = tpu.matmul %97, %84, %cst_38 {dimension_numbers = #tpu.dot_dimension_numbers<[1], [0], [0], [1], [0, 0, 1, 1], [], []>} : vector<8x8xf32>, vector<8x128xf32>, vector<8x128xf32> -> vector<8x128xf32>
    %c8 = arith.constant 8 : index
    %c0_39 = arith.constant 0 : index
    %99 = vector.load %arg5[%c8, %c0_39] : memref<16x512xf32, #tpu.memory_space<vmem>>, vector<8x128xf32>
    tpu.vector_store %arg5[%c8, %c0_39], %98 {strides = array<i32>} : memref<16x512xf32, #tpu.memory_space<vmem>>, vector<8x128xf32>,
    %100 = vector.extract_strided_slice %2 {offsets = [8, 128], sizes = [8, 128], strides = [1, 1]} : vector<16x512xf32> to vector<8x128xf32>
    %101 = vector.extract_strided_slice %4 {offsets = [8, 128], sizes = [8, 128], strides = [1, 1]} : vector<16x512xf32> to vector<8x128xf32>
    %102 = vector.extract_strided_slice %6 {offsets = [8, 128], sizes = [8, 128], strides = [1, 1]} : vector<16x512xf32> to vector<8x128xf32>
    %cst_40 = arith.constant dense<0.000000e+00> : vector<8x8xf32>
    %103 = tpu.matmul %100, %101, %cst_40 {dimension_numbers = #tpu.dot_dimension_numbers<[1], [1], [0], [0], [0, 0, 1, 0], [], []>} : vector<8x128xf32>, vector<8x128xf32>, vector<8x8xf32> -> vector<8x8xf32>
    %cst_41 = arith.constant 0xFF800000 : f32
    %104 = vector.broadcast %cst_41 : f32 to vector<8x8xf32>
    %105 = arith.select %9, %103, %104 : vector<8x8xi1>, vector<8x8xf32>
    %cst_42 = arith.constant dense<0xFF800000> : vector<8xf32>
    %106 = vector.multi_reduction <maximumf>, %105, %cst_42 [1] : vector<8x8xf32> to vector<8xf32>
    %107 = vector.shape_cast %106 : vector<8xf32> to vector<8x1xf32>
    %108 = vector.broadcast %107 : vector<8x1xf32> to vector<8x8xf32>
    %109 = arith.subf %105, %108 : vector<8x8xf32>
    %110 = math.exp %109 : vector<8x8xf32>
    %cst_43 = arith.constant dense<0.000000e+00> : vector<8xf32>
    %111 = vector.multi_reduction <add>, %110, %cst_43 [1] : vector<8x8xf32> to vector<8xf32>
    %112 = vector.shape_cast %111 : vector<8xf32> to vector<8x1xf32>
    %113 = tpu.reciprocal %112 {approx = true} : vector<8x1xf32> -> vector<8x1xf32>
    %114 = vector.broadcast %113 : vector<8x1xf32> to vector<8x8xf32>
    %115 = arith.mulf %110, %114 : vector<8x8xf32>
    %cst_44 = arith.constant dense<0.000000e+00> : vector<8x128xf32>
    %116 = tpu.matmul %115, %102, %cst_44 {dimension_numbers = #tpu.dot_dimension_numbers<[1], [0], [0], [1], [0, 0, 1, 1], [], []>} : vector<8x8xf32>, vector<8x128xf32>, vector<8x128xf32> -> vector<8x128xf32>
    %c8_45 = arith.constant 8 : index
    %c128_46 = arith.constant 128 : index
    %117 = vector.load %arg5[%c8_45, %c128_46] : memref<16x512xf32, #tpu.memory_space<vmem>>, vector<8x128xf32>
    tpu.vector_store %arg5[%c8_45, %c128_46], %116 {strides = array<i32>} : memref<16x512xf32, #tpu.memory_space<vmem>>, vector<8x128xf32>,
    %118 = vector.extract_strided_slice %2 {offsets = [8, 256], sizes = [8, 128], strides = [1, 1]} : vector<16x512xf32> to vector<8x128xf32>
    %119 = vector.extract_strided_slice %4 {offsets = [8, 256], sizes = [8, 128], strides = [1, 1]} : vector<16x512xf32> to vector<8x128xf32>
    %120 = vector.extract_strided_slice %6 {offsets = [8, 256], sizes = [8, 128], strides = [1, 1]} : vector<16x512xf32> to vector<8x128xf32>
    %cst_47 = arith.constant dense<0.000000e+00> : vector<8x8xf32>
    %121 = tpu.matmul %118, %119, %cst_47 {dimension_numbers = #tpu.dot_dimension_numbers<[1], [1], [0], [0], [0, 0, 1, 0], [], []>} : vector<8x128xf32>, vector<8x128xf32>, vector<8x8xf32> -> vector<8x8xf32>
    %cst_48 = arith.constant 0xFF800000 : f32
    %122 = vector.broadcast %cst_48 : f32 to vector<8x8xf32>
    %123 = arith.select %9, %121, %122 : vector<8x8xi1>, vector<8x8xf32>
    %cst_49 = arith.constant dense<0xFF800000> : vector<8xf32>
    %124 = vector.multi_reduction <maximumf>, %123, %cst_49 [1] : vector<8x8xf32> to vector<8xf32>
    %125 = vector.shape_cast %124 : vector<8xf32> to vector<8x1xf32>
    %126 = vector.broadcast %125 : vector<8x1xf32> to vector<8x8xf32>
    %127 = arith.subf %123, %126 : vector<8x8xf32>
    %128 = math.exp %127 : vector<8x8xf32>
    %cst_50 = arith.constant dense<0.000000e+00> : vector<8xf32>
    %129 = vector.multi_reduction <add>, %128, %cst_50 [1] : vector<8x8xf32> to vector<8xf32>
    %130 = vector.shape_cast %129 : vector<8xf32> to vector<8x1xf32>
    %131 = tpu.reciprocal %130 {approx = true} : vector<8x1xf32> -> vector<8x1xf32>
    %132 = vector.broadcast %131 : vector<8x1xf32> to vector<8x8xf32>
    %133 = arith.mulf %128, %132 : vector<8x8xf32>
    %cst_51 = arith.constant dense<0.000000e+00> : vector<8x128xf32>
    %134 = tpu.matmul %133, %120, %cst_51 {dimension_numbers = #tpu.dot_dimension_numbers<[1], [0], [0], [1], [0, 0, 1, 1], [], []>} : vector<8x8xf32>, vector<8x128xf32>, vector<8x128xf32> -> vector<8x128xf32>
    %c8_52 = arith.constant 8 : index
    %c256_53 = arith.constant 256 : index
    %135 = vector.load %arg5[%c8_52, %c256_53] : memref<16x512xf32, #tpu.memory_space<vmem>>, vector<8x128xf32>
    tpu.vector_store %arg5[%c8_52, %c256_53], %134 {strides = array<i32>} : memref<16x512xf32, #tpu.memory_space<vmem>>, vector<8x128xf32>,
    %136 = vector.extract_strided_slice %2 {offsets = [8, 384], sizes = [8, 128], strides = [1, 1]} : vector<16x512xf32> to vector<8x128xf32>
    %137 = vector.extract_strided_slice %4 {offsets = [8, 384], sizes = [8, 128], strides = [1, 1]} : vector<16x512xf32> to vector<8x128xf32>
    %138 = vector.extract_strided_slice %6 {offsets = [8, 384], sizes = [8, 128], strides = [1, 1]} : vector<16x512xf32> to vector<8x128xf32>
    %cst_54 = arith.constant dense<0.000000e+00> : vector<8x8xf32>
    %139 = tpu.matmul %136, %137, %cst_54 {dimension_numbers = #tpu.dot_dimension_numbers<[1], [1], [0], [0], [0, 0, 1, 0], [], []>} : vector<8x128xf32>, vector<8x128xf32>, vector<8x8xf32> -> vector<8x8xf32>
    %cst_55 = arith.constant 0xFF800000 : f32
    %140 = vector.broadcast %cst_55 : f32 to vector<8x8xf32>
    %141 = arith.select %9, %139, %140 : vector<8x8xi1>, vector<8x8xf32>
    %cst_56 = arith.constant dense<0xFF800000> : vector<8xf32>
    %142 = vector.multi_reduction <maximumf>, %141, %cst_56 [1] : vector<8x8xf32> to vector<8xf32>
    %143 = vector.shape_cast %142 : vector<8xf32> to vector<8x1xf32>
    %144 = vector.broadcast %143 : vector<8x1xf32> to vector<8x8xf32>
    %145 = arith.subf %141, %144 : vector<8x8xf32>
    %146 = math.exp %145 : vector<8x8xf32>
    %cst_57 = arith.constant dense<0.000000e+00> : vector<8xf32>
    %147 = vector.multi_reduction <add>, %146, %cst_57 [1] : vector<8x8xf32> to vector<8xf32>
    %148 = vector.shape_cast %147 : vector<8xf32> to vector<8x1xf32>
    %149 = tpu.reciprocal %148 {approx = true} : vector<8x1xf32> -> vector<8x1xf32>
    %150 = vector.broadcast %149 : vector<8x1xf32> to vector<8x8xf32>
    %151 = arith.mulf %146, %150 : vector<8x8xf32>
    %cst_58 = arith.constant dense<0.000000e+00> : vector<8x128xf32>
    %152 = tpu.matmul %151, %138, %cst_58 {dimension_numbers = #tpu.dot_dimension_numbers<[1], [0], [0], [1], [0, 0, 1, 1], [], []>} : vector<8x8xf32>, vector<8x128xf32>, vector<8x128xf32> -> vector<8x128xf32>
    %c8_59 = arith.constant 8 : index
    %c384_60 = arith.constant 384 : index
    %153 = vector.load %arg5[%c8_59, %c384_60] : memref<16x512xf32, #tpu.memory_space<vmem>>, vector<8x128xf32>
    tpu.vector_store %arg5[%c8_59, %c384_60], %152 {strides = array<i32>} : memref<16x512xf32, #tpu.memory_space<vmem>>, vector<8x128xf32>,
    return
  }
  func.func @transform_0(%arg0: i32) -> (i32, i32) {
    %c0_i32 = arith.constant 0 : i32
    %c0_i32_0 = arith.constant 0 : i32
    return %arg0, %c0_i32 : i32, i32
  }
  func.func @transform_1(%arg0: i32) -> (i32, i32) {
    %c0_i32 = arith.constant 0 : i32
    %c0_i32_0 = arith.constant 0 : i32
    %c0_i32_1 = arith.constant 0 : i32
    return %c0_i32, %c0_i32_0 : i32, i32
  }
  func.func @transform_2(%arg0: i32) -> (i32, i32) {
    %c0_i32 = arith.constant 0 : i32
    %c0_i32_0 = arith.constant 0 : i32
    %c0_i32_1 = arith.constant 0 : i32
    return %c0_i32, %c0_i32_0 : i32, i32
  }
  func.func @transform_3(%arg0: i32) -> (i32, i32) {
    %c0_i32 = arith.constant 0 : i32
    %c0_i32_0 = arith.constant 0 : i32
    %c0_i32_1 = arith.constant 0 : i32
    return %c0_i32, %c0_i32_0 : i32, i32
  }
  func.func @transform_4(%arg0: i32) -> (i32, i32) {
    %c0_i32 = arith.constant 0 : i32
    %c0_i32_0 = arith.constant 0 : i32
    return %arg0, %c0_i32 : i32, i32
  }
}

</mosaic_0001>

<bundles_post_ra>
// kernel: tpu_custom_call.1
= control target key start
LH: loop header
LB: loop body
LE: loop exit
PB: predicated region body
PF: predicated region fallthrough
CT: control target
= control target key end

     0   :  { %9 = vsyncpa [#allocation3], 0  ;;  %s2466_s0 = inlined_call_operand.hbm [shape: f32[16,32], index: 0, kind: input, shape index: {}]   ;;  %s2467_s1 = inlined_call_operand.hbm [shape: f32[32,512], index: 1, kind: input, shape index: {}]   ;;  %s2468_s2 = inlined_call_operand.hbm [shape: f32[32,512], index: 2, kind: input, shape index: {}]   ;;  %s2469_s3 = inlined_call_operand.hbm [shape: f32[32,512], index: 3, kind: input, shape index: {}]   ;;  %s2470_s4 = inlined_call_operand.hbm [shape: f32[16,512], index: 4, kind: output, shape index: {}]  }
   0x1   :  { %10 = vsyncpa [#allocation6], 0 }
   0x2   :  { %11 = vsyncpa [#allocation9], 0 }
   0x3   :  { %12 = vsyncpa [#allocation4], 0  ;;  %s2206_s15 = smov [#allocation5]   ;;  %s2088_s19 = scalar_lea.hbm %s2467_s1, 2048 }
   0x4   :  { %s30_s16 = sshll.u32 %s2206_s15, 4  ;;  %p2089_p0 = scmp.ne.s32.totalorder %s2467_s1, %s2088_s19  ;;  %s31_s16 = int_to_ptr.vmem [resolvable:$true] %s30_s16 }
   0x5   :  { %p2092_p1 = scmp.lt.u32.totalorder %s2088_s19, %s2467_s1 }
   0x7   :  { %p2094_p2 = pnand %p2092_p1, %p2089_p0 }
   0x9   :  { %2097 = shalt.err (!%p2094_p2)
}
   0xa   :  { %s2098_s24 = scalar_lea.vmem %s31_s16, 2048  ;;  %p2103_p4 = scmp.lt.s32.totalorder %s31_s16, %s31_s16 }
   0xb   :  { %p2099_p3 = scmp.ne.s32.totalorder %s31_s16, %s2098_s24  ;;  %p2104_p5 = scmp.lt.s32.totalorder %s2098_s24, %s2098_s24 }
   0xd   :  { %p2105_p6 = por %p2104_p5, %p2103_p4 }
   0xf   :  { %p2106_p7 = pnand %p2105_p6, %p2099_p3 }
  0x11   :  { %2109 = shalt.err (!%p2106_p7)
}
  0x12   :  { %s2207_s25 = smov 512   ;;  %s2208_s26 = smov 32  }
  0x13   :  { %36 = dma.hbm_to_vmem [thread:$0]  %s2467_s1, 2048, %s31_s16, [#allocation6], %s2207_s25, %s2207_s25, %s2208_s26  }
  0x14   :  { %s2209_s29 = smov [#allocation2]   ;;  %s2110_s7 = scalar_lea.hbm %s2466_s0, 256 }
  0x15   :  { %s18_s30 = sshll.u32 %s2209_s29, 4  ;;  %p2111_p8 = scmp.ne.s32.totalorder %s2466_s0, %s2110_s7  ;;  %s19_s30 = int_to_ptr.vmem [resolvable:$true] %s18_s30 }
  0x16   :  { %p2114_p9 = scmp.lt.u32.totalorder %s2110_s7, %s2466_s0 }
  0x18   :  { %p2116_p10 = pnand %p2114_p9, %p2111_p8 }
  0x1a   :  { %2119 = shalt.err (!%p2116_p10)
}
  0x1b   :  { %s2120_s12 = scalar_lea.vmem %s19_s30, 256  ;;  %p2125_p12 = scmp.lt.s32.totalorder %s19_s30, %s19_s30 }
  0x1c   :  { %p2121_p11 = scmp.ne.s32.totalorder %s19_s30, %s2120_s12  ;;  %p2126_p13 = scmp.lt.s32.totalorder %s2120_s12, %s2120_s12 }
  0x1e   :  { %p2127_p0 = por %p2126_p13, %p2125_p12 }
  0x20   :  { %p2128_p1 = pnand %p2127_p0, %p2121_p11 }
  0x22   :  { %2131 = shalt.err (!%p2128_p1)
}
  0x23   :  { %s2210_s1 = smov 128   ;;  %s2211_s13 = smov 8  }
  0x24   :  { %24 = dma.hbm_to_vmem [thread:$0]  %s2466_s0, 256, %s19_s30, [#allocation3], %s2210_s1, %s2210_s1, %s2211_s13  }
  0x25   :  { %s2212_s16 = smov [#allocation7]   ;;  %s2213_s18 = smov [#allocation8]  }
  0x26   :  { %s42_s17 = sshll.u32 %s2212_s16, 4  ;;  %s54_s19 = sshll.u32 %s2213_s18, 4  ;;  %s43_s17 = int_to_ptr.vmem [resolvable:$true] %s42_s17  ;;  %s2269_s19 = int_to_ptr.vmem [resolvable:$true] %s54_s19 }
  0x27   :  { %s2132_s22 = scalar_lea.hbm %s2468_s2, 2048 }
  0x28   :  { %p2133_p2 = scmp.ne.s32.totalorder %s2468_s2, %s2132_s22  ;;  %p2136_p3 = scmp.lt.u32.totalorder %s2132_s22, %s2468_s2 }
  0x2a   :  { %p2138_p4 = pnand %p2136_p3, %p2133_p2 }
  0x2c   :  { %2141 = shalt.err (!%p2138_p4)
}
  0x2d   :  { %s2142_s0 = scalar_lea.vmem %s43_s17, 2048  ;;  %p2147_p6 = scmp.lt.s32.totalorder %s43_s17, %s43_s17 }
  0x2e   :  { %p2143_p5 = scmp.ne.s32.totalorder %s43_s17, %s2142_s0  ;;  %p2148_p7 = scmp.lt.s32.totalorder %s2142_s0, %s2142_s0 }
  0x30   :  { %p2149_p8 = por %p2148_p7, %p2147_p6 }
  0x32   :  { %p2150_p9 = pnand %p2149_p8, %p2143_p5 }
  0x34   :  { %2153 = shalt.err (!%p2150_p9)
}
  0x35   :  { %48 = dma.hbm_to_vmem [thread:$0]  %s2468_s2, 2048, %s43_s17, [#allocation6], %s2207_s25, %s2207_s25, %s2208_s26  }
  0x36   :  { %s2154_s7 = scalar_lea.hbm %s2469_s3, 2048 }
  0x37   :  { %p2155_p10 = scmp.ne.s32.totalorder %s2469_s3, %s2154_s7  ;;  %p2158_p11 = scmp.lt.u32.totalorder %s2154_s7, %s2469_s3 }
  0x39   :  { %p2160_p12 = pnand %p2158_p11, %p2155_p10 }
  0x3b   :  { %2163 = shalt.err (!%p2160_p12)
}
  0x3c   :  { %s2164_s12 = scalar_lea.vmem %s2269_s19, 2048  ;;  %p2169_p0 = scmp.lt.s32.totalorder %s2269_s19, %s2269_s19 }
  0x3d   :  { %p2165_p13 = scmp.ne.s32.totalorder %s2269_s19, %s2164_s12  ;;  %p2170_p1 = scmp.lt.s32.totalorder %s2164_s12, %s2164_s12 }
  0x3f   :  { %p2171_p2 = por %p2170_p1, %p2169_p0 }
  0x41   :  { %p2172_p3 = pnand %p2171_p2, %p2165_p13 }
  0x43   :  { %2175 = shalt.err (!%p2172_p3)
}
  0x44   :  { %60 = dma.hbm_to_vmem [thread:$0]  %s2469_s3, 2048, %s2269_s19, [#allocation9], %s2207_s25, %s2207_s25, %s2208_s26  }
  0x45   :  { %2198 = dma.done.wait [#allocation3], 256  }
  0x46   :  { %2199 = vsyncadd [#allocation3], 4294967040 }
  0x47   :  { %2200 = dma.done.wait [#allocation6], 4096  }
  0x48   :  { %2201 = vsyncadd [#allocation6], 4294963200 }
  0x49   :  { %2202 = dma.done.wait [#allocation9], 2048  }
  0x4a   :  { %2203 = vsyncadd [#allocation9], 4294965248  ;;  %v2214_v0 = vmov 0.0   ;;  %v76_v1 = vld [vmem:[#allocation5 + $0x8] sm:$0xff]  ;;  %v75_v3 = vld [vmem:[#allocation5] sm:$0xff]  ;;  %vm91_vm0 = vcmask 261120  }
  0x4b   :  { %162 = vmatprep.mubr.f32.mxu0 %v2214_v0  ;;  %239 = vmatprep.mubr.f32.mxu1 %v2214_v0  ;;  %v80_v2 = vld [vmem:[#allocation5 + $0x28] sm:$0xff]  ;;  %v79_v5 = vld [vmem:[#allocation5 + $0x20] sm:$0xff]  ;;  %v78_v12 = vld [vmem:[#allocation5 + $0x18] sm:$0xff]  ;;  %vm2215_vm1 = vmmov 0   ;;  %vm668_vm3 = vcmask 64512   ;;  %s2216_s3 = smov [#allocation10]  }
  0x4c   :  { %v1997_v4 = vpack.c.bf16 %v80_v2, %v76_v1  ;;  %v84_v6 = vld [vmem:[#allocation5 + $0x48] sm:$0xff]  ;;  %v1999_v8 = vpack.c.bf16 %v79_v5, %v75_v3  ;;  %v83_v10 = vld [vmem:[#allocation5 + $0x40] sm:$0xff]  ;;  %v82_v13 = vld [vmem:[#allocation5 + $0x38] sm:$0xff]  ;;  %s1851_s13 = sshll.u32 %s2216_s3, 4  ;;  %s1852_s13 = int_to_ptr.vmem [resolvable:$true] %s1851_s13 }
  0x4d   :  { %v88_v7 = vld [vmem:[#allocation5 + $0x68] sm:$0xff]  ;;  %v87_v11 = vld [vmem:[#allocation5 + $0x60] sm:$0xff]  ;;  %v2005_v16 = vpack.c.bf16 %v82_v13, %v78_v12  ;;  %v77_v18 = vld [vmem:[#allocation5 + $0x10] sm:$0xff]  ;;  %s2176_s14 = scalar_lea.vmem %s1852_s13, 1024  ;;  %p2181_p5 = scmp.lt.s32.totalorder %s1852_s13, %s1852_s13 }
  0x4e   :  { %v2001_v9 = vpack.c.bf16 %v88_v7, %v84_v6  ;;  %1998 = vmatprep.subr.bf16.mxu0 %v1997_v4  ;;  %v253_v14 = vld [vmem:[#allocation7 + $0x8] sm:$0xff]  ;;  %v2003_v15 = vpack.c.bf16 %v87_v11, %v83_v10  ;;  %v81_v19 = vld [vmem:[#allocation5 + $0x30] sm:$0xff]  ;;  %v252_v22 = vld [vmem:[#allocation7] sm:$0xff]  ;;  %p2177_p4 = scmp.ne.s32.totalorder %s1852_s13, %s2176_s14  ;;  %p2182_p6 = scmp.lt.s32.totalorder %s2176_s14, %s2176_s14 }
  0x4f   :  { %2000 = vmatpush1.bf16.msra.mxu0 %v1999_v8  ;;  %v257_v17 = vld [vmem:[#allocation7 + $0x28] sm:$0xff]  ;;  %v2007_v21 = vpack.c.bf16 %v81_v19, %v77_v18  ;;  %v256_v23 = vld [vmem:[#allocation7 + $0x20] sm:$0xff]  ;;  %v2308_v24 = vld [vmem:[#allocation2] sm:$0xff]  ;;  %2006 = vmatprep.subr.bf16.mxu1 %v2005_v16 }
  0x50   :  { %2002 = vmatprep.subr.bf16.mxu0 %v2001_v9  ;;  %v2013_v20 = vpack.c.bf16 %v257_v17, %v253_v14  ;;  %v86_v25 = vld [vmem:[#allocation5 + $0x58] sm:$0xff]  ;;  %v261_v27 = vld [vmem:[#allocation7 + $0x48] sm:$0xff]  ;;  %v85_v30 = vld [vmem:[#allocation5 + $0x50] sm:$0xff]  ;;  %v2015_v32 = vpack.c.bf16 %v256_v23, %v252_v22  ;;  %p2183_p7 = por %p2182_p6, %p2181_p5 }
  0x51   :  { %v90_v26 = vld [vmem:[#allocation5 + $0x78] sm:$0xff]  ;;  %2008 = vmatpush1.bf16.msra.mxu1 %v2007_v21  ;;  %v265_v29 = vld [vmem:[#allocation7 + $0x68] sm:$0xff]  ;;  %v89_v31 = vld [vmem:[#allocation5 + $0x70] sm:$0xff] }
  0x52   :  { %v2009_v28 = vpack.c.bf16 %v90_v26, %v86_v25  ;;  %v2011_v33 = vpack.c.bf16 %v89_v31, %v85_v30  ;;  %v260_v34 = vld [vmem:[#allocation7 + $0x40] sm:$0xff]  ;;  %v255_v36 = vld [vmem:[#allocation7 + $0x18] sm:$0xff]  ;;  %v2017_v37 = vpack.c.bf16 %v265_v29, %v261_v27  ;;  %v254_v39 = vld [vmem:[#allocation7 + $0x10] sm:$0xff]  ;;  %p2184_p8 = pnand %p2183_p7, %p2177_p4 }
  0x53   :  { %2004 = vmatpush1.bf16.msra.mxu0 %v2003_v15  ;;  %v264_v35 = vld [vmem:[#allocation7 + $0x60] sm:$0xff]  ;;  %v259_v38 = vld [vmem:[#allocation7 + $0x38] sm:$0xff]  ;;  %v258_v40 = vld [vmem:[#allocation7 + $0x30] sm:$0xff] }
  0x54   :  { %2014 = vmatprep.subr.bf16.mxu0 %v2013_v20  ;;  %2010 = vmatprep.subr.bf16.mxu1 %v2009_v28  ;;  %v2021_v41 = vpack.c.bf16 %v259_v38, %v255_v36  ;;  %v263_v42 = vld [vmem:[#allocation7 + $0x58] sm:$0xff]  ;;  %v2023_v44 = vpack.c.bf16 %v258_v40, %v254_v39  ;;  %v423_v45 = vld [vmem:[#allocation8 + $0x8] sm:$0xff]  ;;  %v2019_v48 = vpack.c.bf16 %v264_v35, %v260_v34  ;;  %v262_v49 = vld [vmem:[#allocation7 + $0x50] sm:$0xff] }
  0x55   :  { %v267_v43 = vld [vmem:[#allocation7 + $0x78] sm:$0xff]  ;;  %2012 = vmatpush1.bf16.msra.mxu1 %v2011_v33  ;;  %v427_v46 = vld [vmem:[#allocation8 + $0x28] sm:$0xff]  ;;  %v266_v50 = vld [vmem:[#allocation7 + $0x70] sm:$0xff] }
  0x56   :  { %1865 = vmatmul.mubr.msk.f32.vlgmr.msra.gmra.mrb[0].mxu0 %vm91_vm0, %v2308_v24  ;;  %v2313_v47 = vld [vmem:[#allocation2 + $0x8] sm:$0xff]  ;;  %2022 = vmatprep.subr.bf16.mxu1 %v2021_v41  ;;  %v2025_v51 = vpack.c.bf16 %v267_v43, %v263_v42  ;;  %v2029_v52 = vpack.c.bf16 %v427_v46, %v423_v45  ;;  %v422_v53 = vld [vmem:[#allocation8] sm:$0xff]  ;;  %v2027_v55 = vpack.c.bf16 %v266_v50, %v262_v49  ;;  %v431_v56 = vld [vmem:[#allocation8 + $0x48] sm:$0xff] }
  0x57   :  { %2016 = vmatpush1.bf16.msra.mxu0 %v2015_v32  ;;  %168 = vmatprep.mubr.f32.mxu0 %v2214_v0  ;;  %v426_v54 = vld [vmem:[#allocation8 + $0x20] sm:$0xff]  ;;  %v435_v57 = vld [vmem:[#allocation8 + $0x68] sm:$0xff]  ;;  %v425_v63 = vld [vmem:[#allocation8 + $0x18] sm:$0xff]  ;;  %v592_v32 = vlaneseq }
  0x58   :  { %2018 = vmatprep.subr.bf16.mxu0 %v2017_v37  ;;  %1867 = vmatmul.mubr.msk.f32.vlgmr.msra.gmra.mrb[0].mxu1 %vm91_vm0, %v2308_v24  ;;  %v2031_v58 = vpack.c.bf16 %v426_v54, %v422_v53  ;;  %v2033_v59 = vpack.c.bf16 %v435_v57, %v431_v56  ;;  %v430_v60 = vld [vmem:[#allocation8 + $0x40] sm:$0xff]  ;;  %v429_v1 = vld [vmem:[#allocation8 + $0x38] sm:$0xff]  ;;  %v424_v2 = vld [vmem:[#allocation8 + $0x10] sm:$0xff] }
  0x59   :  { %2024 = vmatpush1.bf16.msra.mxu1 %v2023_v44  ;;  %245 = vmatprep.mubr.f32.mxu1 %v2214_v0  ;;  %v434_v61 = vld [vmem:[#allocation8 + $0x60] sm:$0xff]  ;;  %v2037_v3 = vpack.c.bf16 %v429_v1, %v425_v63  ;;  %v428_v4 = vld [vmem:[#allocation8 + $0x30] sm:$0xff]  ;;  %v433_v5 = vld [vmem:[#allocation8 + $0x58] sm:$0xff]  ;;  %v593_v33 = vshrl.u32 %v592_v32, 7  ;;  %v595_v34 = vand.u32 127, %v592_v32 }
  0x5a   :  { %1866 = vmatmul.mubr.msk.f32.gmra.mrb[2].mxu0 %vm91_vm0, %v2313_v47  ;;  %2026 = vmatprep.subr.bf16.mxu1 %v2025_v51  ;;  %v2035_v62 = vpack.c.bf16 %v434_v61, %v430_v60  ;;  %v437_v6 = vld [vmem:[#allocation8 + $0x78] sm:$0xff]  ;;  %v2039_v7 = vpack.c.bf16 %v428_v4, %v424_v2  ;;  %v432_v9 = vld [vmem:[#allocation8 + $0x50] sm:$0xff] }
  0x5b   :  { %2020 = vmatpush1.bf16.msra.mxu0 %v2019_v48  ;;  %332 = vmatprep.mubr.f32.mxu0 %v2214_v0  ;;  %v2041_v8 = vpack.c.bf16 %v437_v6, %v433_v5  ;;  %v436_v10 = vld [vmem:[#allocation8 + $0x70] sm:$0xff]  ;;  %vm2380_vm2 = vcmp.le.s32.totalorder %v595_v34, %v593_v33 }
  0x5c   :  { %1868 = vmatmul.mubr.msk.f32.gmra.mrb[2].mxu1 %vm91_vm0, %v2313_v47  ;;  %2030 = vmatprep.subr.bf16.mxu0 %v2029_v52  ;;  %v2043_v11 = vpack.c.bf16 %v436_v10, %v432_v9 }
  0x5d   :  { %2028 = vmatpush1.bf16.msra.mxu1 %v2027_v55  ;;  %409 = vmatprep.mubr.f32.mxu1 %v2214_v0 }
  0x5e   :  { %1869 = vmatmul.mubr.msk.f32.vlgmr.msra.gmra.mrb[4].mxu0 %vm91_vm0, %v2308_v24  ;;  %2038 = vmatprep.subr.bf16.mxu1 %v2037_v3 }
  0x5f   :  { %338 = vmatprep.mubr.f32.mxu0 %v2214_v0  ;;  %2032 = vmatpush1.bf16.msra.mxu0 %v2031_v58 }
  0x60   :  { %1871 = vmatmul.mubr.msk.f32.vlgmr.msra.gmra.mrb[4].mxu1 %vm91_vm0, %v2308_v24  ;;  %2034 = vmatprep.subr.bf16.mxu0 %v2033_v59 }
  0x61   :  { %415 = vmatprep.mubr.f32.mxu1 %v2214_v0  ;;  %2040 = vmatpush1.bf16.msra.mxu1 %v2039_v7 }
  0x62   :  { %1870 = vmatmul.mubr.msk.f32.gmra.mrb[6].mxu0 %vm91_vm0, %v2313_v47  ;;  %2042 = vmatprep.subr.bf16.mxu1 %v2041_v8 }
  0x63   :  { %502 = vmatprep.mubr.f32.mxu0 %v2214_v0  ;;  %2036 = vmatpush1.bf16.msra.mxu0 %v2035_v62 }
  0x64   :  { %1872 = vmatmul.mubr.msk.f32.gmra.mrb[6].mxu1 %vm91_vm0, %v2313_v47  ;;  %1917 = vmatprep.subr.mxu0 %v2214_v0 }
  0x65   :  { %579 = vmatprep.mubr.f32.mxu1 %v2214_v0  ;;  %2044 = vmatpush1.bf16.msra.mxu1 %v2043_v11 }
  0x66   :  { %1873 = vmatmul.mubr.msk.f32.vlgmr.msra.gmra.mrb[8].mxu0 %vm91_vm0, %v2308_v24  ;;  %1922 = vmatprep.subr.mxu1 %v2214_v0 }
  0x67   :  { %508 = vmatprep.mubr.f32.mxu0 %v2214_v0 }
  0x68   :  { %1875 = vmatmul.mubr.msk.f32.vlgmr.msra.gmra.mrb[8].mxu1 %vm91_vm0, %v2308_v24 }
  0x69   :  { %585 = vmatprep.mubr.f32.mxu1 %v2214_v0 }
  0x6a   :  { %1874 = vmatmul.mubr.msk.f32.gmra.mrb[10].mxu0 %vm91_vm0, %v2313_v47 }
  0x6b   :  { %1919 = vmatprep.mubr.msk.f32.mxu0 %vm2215_vm1, %v2214_v0 }
  0x6c   :  { %1876 = vmatmul.mubr.msk.f32.gmra.mrb[10].mxu1 %vm91_vm0, %v2313_v47 }
  0x6d   :  { %1924 = vmatprep.mubr.msk.f32.mxu1 %vm2215_vm1, %v2214_v0 }
 0x129   :  { %v164_v12 = vpop.f32.mrb[0].mxu0 }
 0x12a   :  { %v166_v13 = vpop.f32.mrb[1].mxu0 }
 0x12b   :  { %v241_v14 = vpop.f32.mrb[0].mxu1 }
 0x12c   :  { %v243_v16 = vpop.f32.mrb[1].mxu1 }
 0x12d   :  { %v170_v15 = vpop.f32.mrb[2].mxu0 }
 0x12e   :  { %v172_v17 = vpop.f32.mrb[3].mxu0 }
 0x12f   :  { %v247_v18 = vpop.f32.mrb[2].mxu1 }
 0x130   :  { %v249_v20 = vpop.f32.mrb[3].mxu1 }
 0x131   :  { %v334_v19 = vpop.f32.mrb[4].mxu0 }
 0x132   :  { %v336_v21 = vpop.f32.mrb[5].mxu0  ;;  %1918 = vmatpush3.xpose.msra.mxu0 %v334_v19 }
 0x133   :  { %1927 = vmatprep.subr.mxu0 %v2214_v0  ;;  %v411_v22 = vpop.f32.mrb[4].mxu1 }
 0x134   :  { %v413_v23 = vpop.f32.mrb[5].mxu1 }
 0x135   :  { %1920 = vmatmul.mubr.f32.vlgmr.msra.gmra.mrb[12].mxu0 %v164_v12  ;;  %v340_v24 = vpop.f32.mrb[6].mxu0 }
 0x136   :  { %1928 = vmatpush3.xpose.msra.mxu0 %v336_v21  ;;  %1929 = vmatprep.mubr.msk.f32.mxu0 %vm2215_vm1, %v2214_v0  ;;  %v342_v25 = vpop.f32.mrb[7].mxu0 }
 0x137   :  { %1937 = vmatprep.subr.mxu0 %v2214_v0  ;;  %v417_v26 = vpop.f32.mrb[6].mxu1 }
 0x138   :  { %v419_v27 = vpop.f32.mrb[7].mxu1 }
 0x139   :  { %1930 = vmatmul.mubr.f32.vlgmr.msra.gmra.mrb[14].mxu0 %v166_v13  ;;  %v504_v28 = vpop.f32.mrb[8].mxu0 }
 0x13a   :  { %1938 = vmatpush3.xpose.msra.mxu0 %v411_v22  ;;  %1939 = vmatprep.mubr.msk.f32.mxu0 %vm2215_vm1, %v2214_v0  ;;  %v2373_v29 = vpop.f32.mrb[9].mxu0 }
 0x13b   :  { %1947 = vmatprep.subr.mxu0 %v2214_v0  ;;  %1923 = vmatpush3.msra.mxu1 %v504_v28 }
 0x13c   :  { %1932 = vmatprep.subr.mxu1 %v2214_v0 }
 0x13d   :  { %1940 = vmatmul.mubr.f32.vlgmr.msra.gmra.mrb[16].mxu0 %v241_v14  ;;  %v2376_v30 = vpop.f32.mrb[10].mxu0 }
 0x13e   :  { %1948 = vmatpush3.xpose.msra.mxu0 %v413_v23  ;;  %1949 = vmatprep.mubr.msk.f32.mxu0 %vm2215_vm1, %v2214_v0  ;;  %v2378_v31 = vpop.f32.mrb[11].mxu0 }
 0x13f   :  { %1957 = vmatprep.subr.mxu0 %v2214_v0 }
 0x141   :  { %1950 = vmatmul.mubr.f32.vlgmr.msra.gmra.mrb[18].mxu0 %v243_v16 }
 0x142   :  { %1958 = vmatpush3.xpose.msra.mxu0 %v340_v24  ;;  %1959 = vmatprep.mubr.msk.f32.mxu0 %vm2215_vm1, %v2214_v0 }
 0x143   :  { %1967 = vmatprep.subr.mxu0 %v2214_v0 }
 0x145   :  { %1960 = vmatmul.mubr.f32.vlgmr.msra.gmra.mrb[20].mxu0 %v170_v15 }
 0x146   :  { %1968 = vmatpush3.xpose.msra.mxu0 %v342_v25  ;;  %1969 = vmatprep.mubr.msk.f32.mxu0 %vm2215_vm1, %v2214_v0 }
 0x147   :  { %1977 = vmatprep.subr.mxu0 %v2214_v0 }
 0x149   :  { %1970 = vmatmul.mubr.f32.vlgmr.msra.gmra.mrb[22].mxu0 %v172_v17 }
 0x14a   :  { %1978 = vmatpush3.xpose.msra.mxu0 %v417_v26  ;;  %1979 = vmatprep.mubr.msk.f32.mxu0 %vm2215_vm1, %v2214_v0 }
 0x14b   :  { %1987 = vmatprep.subr.mxu0 %v2214_v0 }
 0x14d   :  { %1980 = vmatmul.mubr.f32.vlgmr.msra.gmra.mrb[24].mxu0 %v247_v18 }
 0x14e   :  { %1988 = vmatpush3.xpose.msra.mxu0 %v419_v27  ;;  %1989 = vmatprep.mubr.msk.f32.mxu0 %vm2215_vm1, %v2214_v0 }
 0x151   :  { %1990 = vmatmul.mubr.f32.vlgmr.msra.gmra.mrb[26].mxu0 %v249_v20 }
 0x208   :  { %v663_v36 = vpop.f32.mrb[12].mxu0 }
 0x209   :  { %v667_v37 = vsel %vm2380_vm2, %v663_v36, -inf  ;;  %v1921_v38 = vpop.f32.mrb[13].mxu0 }
 0x20a   :  { %v669_v39 = vsel %vm668_vm3, %v667_v37, -inf }
 0x20b   :  { %670 = vmax.xlane.f32.xlu0 %v669_v39 }
 0x20c   :  { %v820_v40 = vpop.f32.mrb[14].mxu0 }
 0x20d   :  { %v824_v41 = vsel %vm2380_vm2, %v820_v40, -inf  ;;  %v1931_v42 = vpop.f32.mrb[15].mxu0 }
 0x20e   :  { %v825_v43 = vsel %vm668_vm3, %v824_v41, -inf }
 0x20f   :  { %826 = vmax.xlane.f32.xlu0 %v825_v43 }
 0x210   :  { %v976_v44 = vpop.f32.mrb[16].mxu0 }
 0x211   :  { %v980_v45 = vsel %vm2380_vm2, %v976_v44, -inf  ;;  %v1941_v46 = vpop.f32.mrb[17].mxu0 }
 0x212   :  { %v981_v47 = vsel %vm668_vm3, %v980_v45, -inf }
 0x213   :  { %982 = vmax.xlane.f32.xlu1 %v981_v47 }
 0x214   :  { %v1132_v48 = vpop.f32.mrb[18].mxu0 }
 0x215   :  { %v1136_v49 = vsel %vm2380_vm2, %v1132_v48, -inf  ;;  %v1951_v50 = vpop.f32.mrb[19].mxu0  ;;  %v581_v48 = vpop.f32.mrb[8].mxu1 }
 0x216   :  { %v1137_v51 = vsel %vm668_vm3, %v1136_v49, -inf }
 0x217   :  { %1138 = vmax.xlane.f32.xlu1 %v1137_v51 }
 0x218   :  { %v1288_v52 = vpop.f32.mrb[20].mxu0 }
 0x219   :  { %v1292_v53 = vsel %vm2380_vm2, %v1288_v52, -inf  ;;  %v1961_v54 = vpop.f32.mrb[21].mxu0 }
 0x21a   :  { %v1293_v55 = vsel %vm668_vm3, %v1292_v53, -inf }
 0x21b   :  { %1294 = vmax.xlane.f32.xlu0 %v1293_v55 }
 0x21c   :  { %v1444_v56 = vpop.f32.mrb[22].mxu0 }
 0x21d   :  { %v1448_v57 = vsel %vm2380_vm2, %v1444_v56, -inf  ;;  %v1971_v58 = vpop.f32.mrb[23].mxu0 }
 0x21e   :  { %v1449_v59 = vsel %vm668_vm3, %v1448_v57, -inf }
 0x21f   :  { %1450 = vmax.xlane.f32.xlu1 %v1449_v59 }
 0x220   :  { %v1600_v60 = vpop.f32.mrb[24].mxu0 }
 0x221   :  { %v1604_v61 = vsel %vm2380_vm2, %v1600_v60, -inf  ;;  %v1981_v62 = vpop.f32.mrb[25].mxu0 }
 0x222   :  { %v1605_v63 = vsel %vm668_vm3, %v1604_v61, -inf }
 0x223   :  { %1606 = vmax.xlane.f32.xlu0 %v1605_v63 }
 0x224   :  { %v1756_v1 = vpop.f32.mrb[26].mxu0 }
 0x225   :  { %v1760_v2 = vsel %vm2380_vm2, %v1756_v1, -inf  ;;  %v1991_v3 = vpop.f32.mrb[27].mxu0 }
 0x226   :  { %v1761_v4 = vsel %vm668_vm3, %v1760_v2, -inf }
 0x227   :  { %1762 = vmax.xlane.f32.xlu1 %v1761_v4 }
 0x298   :  { %v671_v5 = vpop.xlane.xlu0 %670 }
 0x299   :  { %v672_v6 = vsub.f32 %v667_v37, %v671_v5 }
 0x29b   :  { %v673_v7 = vmul.f32 1.442695, %v672_v6 }
 0x29c   :  { %v827_v8 = vpop.xlane.xlu0 %826 }
 0x29d   :  { %2056 = vpow2.f32 %v673_v7  ;;  %v828_v9 = vsub.f32 %v824_v41, %v827_v8 }
 0x29f   :  { %v829_v10 = vmul.f32 1.442695, %v828_v9 }
 0x2a0   :  { %v983_v11 = vpop.xlane.xlu1 %982 }
 0x2a1   :  { %2058 = vpow2.f32 %v829_v10  ;;  %v984_v12 = vsub.f32 %v980_v45, %v983_v11 }
 0x2a3   :  { %v985_v13 = vmul.f32 1.442695, %v984_v12 }
 0x2a4   :  { %v1139_v14 = vpop.xlane.xlu1 %1138 }
 0x2a5   :  { %2060 = vpow2.f32 %v985_v13  ;;  %v1140_v15 = vsub.f32 %v1136_v49, %v1139_v14  ;;  %v583_v49 = vpop.f32.mrb[9].mxu1 }
 0x2a6   :  { %v587_v50 = vpop.f32.mrb[10].mxu1 }
 0x2a7   :  { %v2057_v16 = vpop.eup %2056  ;;  %v1141_v17 = vmul.f32 1.442695, %v1140_v15  ;;  %v589_v51 = vpop.f32.mrb[11].mxu1 }
 0x2a8   :  { %v1295_v18 = vpop.xlane.xlu0 %1294  ;;  %v675_v19 = vsel %vm668_vm3, %v2057_v16, 0.0 }
 0x2a9   :  { %2062 = vpow2.f32 %v1141_v17  ;;  %v1296_v20 = vsub.f32 %v1292_v53, %v1295_v18  ;;  %676 = vadd.xlane.f32.xlu0 %v675_v19 }
 0x2ab   :  { %v2059_v21 = vpop.eup %2058  ;;  %v1297_v22 = vmul.f32 1.442695, %v1296_v20 }
 0x2ac   :  { %v1451_v23 = vpop.xlane.xlu1 %1450  ;;  %v831_v24 = vsel %vm668_vm3, %v2059_v21, 0.0 }
 0x2ad   :  { %2064 = vpow2.f32 %v1297_v22  ;;  %v1452_v25 = vsub.f32 %v1448_v57, %v1451_v23  ;;  %832 = vadd.xlane.f32.xlu1 %v831_v24 }
 0x2af   :  { %v2061_v26 = vpop.eup %2060  ;;  %v1453_v27 = vmul.f32 1.442695, %v1452_v25 }
 0x2b0   :  { %v1607_v28 = vpop.xlane.xlu0 %1606  ;;  %v987_v32 = vsel %vm668_vm3, %v2061_v26, 0.0 }
 0x2b1   :  { %2066 = vpow2.f32 %v1453_v27  ;;  %v1608_v33 = vsub.f32 %v1604_v61, %v1607_v28  ;;  %988 = vadd.xlane.f32.xlu0 %v987_v32 }
 0x2b3   :  { %v2063_v34 = vpop.eup %2062  ;;  %v1609_v35 = vmul.f32 1.442695, %v1608_v33 }
 0x2b4   :  { %v1763_v36 = vpop.xlane.xlu1 %1762  ;;  %v1143_v37 = vsel %vm668_vm3, %v2063_v34, 0.0 }
 0x2b5   :  { %2068 = vpow2.f32 %v1609_v35  ;;  %v1764_v38 = vsub.f32 %v1760_v2, %v1763_v36  ;;  %1144 = vadd.xlane.f32.xlu1 %v1143_v37 }
 0x2b7   :  { %v2065_v39 = vpop.eup %2064  ;;  %v1765_v40 = vmul.f32 1.442695, %v1764_v38 }
 0x2b8   :  { %v1299_v41 = vsel %vm668_vm3, %v2065_v39, 0.0 }
 0x2b9   :  { %2070 = vpow2.f32 %v1765_v40  ;;  %1300 = vadd.xlane.f32.xlu0 %v1299_v41 }
 0x2bb   :  { %v2067_v42 = vpop.eup %2066 }
 0x2bc   :  { %v1455_v43 = vsel %vm668_vm3, %v2067_v42, 0.0 }
 0x2bd   :  { %1456 = vadd.xlane.f32.xlu1 %v1455_v43 }
 0x2bf   :  { %v2069_v44 = vpop.eup %2068 }
 0x2c0   :  { %v1611_v45 = vsel %vm668_vm3, %v2069_v44, 0.0 }
 0x2c1   :  { %1612 = vadd.xlane.f32.xlu0 %v1611_v45 }
 0x2c3   :  { %v2415_v46 = vpop.eup %2070 }
 0x2c4   :  { %v1767_v47 = vsel %vm668_vm3, %v2415_v46, 0.0 }
 0x2c5   :  { %1768 = vadd.xlane.f32.xlu1 %v1767_v47 }
 0x336   :  { %v677_v52 = vpop.xlane.xlu0 %676 }
 0x337   :  { %2072 = vrcp.f32 %v677_v52 }
 0x33a   :  { %v833_v53 = vpop.xlane.xlu1 %832 }
 0x33b   :  { %2074 = vrcp.f32 %v833_v53 }
 0x33e   :  { %v989_v54 = vpop.xlane.xlu0 %988 }
 0x33f   :  { %2076 = vrcp.f32 %v989_v54 }
 0x341   :  { %v2073_v55 = vpop.eup %2072 }
 0x342   :  { %v679_v56 = vmul.f32 %v2073_v55, %v2057_v16  ;;  %v1145_v57 = vpop.xlane.xlu1 %1144 }
 0x343   :  { %2078 = vrcp.f32 %v1145_v57 }
 0x344   :  { %1925 = vmatmul.mubr.msk.f32.vlgmr.msra.gmra.mrb[12].mxu1 %vm668_vm3, %v679_v56 }
 0x345   :  { %v2075_v58 = vpop.eup %2074  ;;  %1933 = vmatpush3.msra.mxu1 %v2373_v29  ;;  %1934 = vmatprep.mubr.msk.f32.mxu1 %vm2215_vm1, %v2214_v0 }
 0x346   :  { %v835_v59 = vmul.f32 %v2075_v58, %v2059_v21  ;;  %v1301_v60 = vpop.xlane.xlu0 %1300  ;;  %1942 = vmatprep.subr.mxu1 %v2214_v0 }
 0x347   :  { %2080 = vrcp.f32 %v1301_v60 }
 0x348   :  { %1935 = vmatmul.mubr.msk.f32.vlgmr.msra.gmra.mrb[14].mxu1 %vm668_vm3, %v835_v59 }
 0x349   :  { %v2077_v61 = vpop.eup %2076  ;;  %1943 = vmatpush3.msra.mxu1 %v581_v48  ;;  %1944 = vmatprep.mubr.msk.f32.mxu1 %vm2215_vm1, %v2214_v0 }
 0x34a   :  { %v991_v62 = vmul.f32 %v2077_v61, %v2061_v26  ;;  %v1457_v63 = vpop.xlane.xlu1 %1456  ;;  %1952 = vmatprep.subr.mxu1 %v2214_v0 }
 0x34b   :  { %2082 = vrcp.f32 %v1457_v63 }
 0x34c   :  { %1945 = vmatmul.mubr.msk.f32.vlgmr.msra.gmra.mrb[16].mxu1 %vm668_vm3, %v991_v62 }
 0x34d   :  { %v2079_v29 = vpop.eup %2078  ;;  %1953 = vmatpush3.msra.mxu1 %v583_v49  ;;  %1954 = vmatprep.mubr.msk.f32.mxu1 %vm2215_vm1, %v2214_v0 }
 0x34e   :  { %v1147_v1 = vmul.f32 %v2079_v29, %v2063_v34  ;;  %v1613_v2 = vpop.xlane.xlu0 %1612  ;;  %1962 = vmatprep.subr.mxu1 %v2214_v0 }
 0x34f   :  { %2084 = vrcp.f32 %v1613_v2 }
 0x350   :  { %1955 = vmatmul.mubr.msk.f32.vlgmr.msra.gmra.mrb[18].mxu1 %vm668_vm3, %v1147_v1 }
 0x351   :  { %v2081_v3 = vpop.eup %2080  ;;  %1963 = vmatpush3.msra.mxu1 %v2376_v30  ;;  %1964 = vmatprep.mubr.msk.f32.mxu1 %vm2215_vm1, %v2214_v0 }
 0x352   :  { %v1303_v4 = vmul.f32 %v2081_v3, %v2065_v39  ;;  %v1769_v5 = vpop.xlane.xlu1 %1768  ;;  %1972 = vmatprep.subr.mxu1 %v2214_v0 }
 0x353   :  { %2086 = vrcp.f32 %v1769_v5 }
 0x354   :  { %1965 = vmatmul.mubr.msk.f32.vlgmr.msra.gmra.mrb[20].mxu1 %vm668_vm3, %v1303_v4 }
 0x355   :  { %v2083_v6 = vpop.eup %2082  ;;  %1973 = vmatpush3.msra.mxu1 %v2378_v31  ;;  %1974 = vmatprep.mubr.msk.f32.mxu1 %vm2215_vm1, %v2214_v0 }
 0x356   :  { %v1459_v7 = vmul.f32 %v2083_v6, %v2067_v42  ;;  %1982 = vmatprep.subr.mxu1 %v2214_v0 }
 0x358   :  { %1975 = vmatmul.mubr.msk.f32.vlgmr.msra.gmra.mrb[22].mxu1 %vm668_vm3, %v1459_v7 }
 0x359   :  { %v2085_v30 = vpop.eup %2084  ;;  %1983 = vmatpush3.msra.mxu1 %v587_v50  ;;  %1984 = vmatprep.mubr.msk.f32.mxu1 %vm2215_vm1, %v2214_v0 }
 0x35a   :  { %v1615_v8 = vmul.f32 %v2085_v30, %v2069_v44  ;;  %1992 = vmatprep.subr.mxu1 %v2214_v0 }
 0x35c   :  { %1985 = vmatmul.mubr.msk.f32.vlgmr.msra.gmra.mrb[24].mxu1 %vm668_vm3, %v1615_v8 }
 0x35d   :  { %v2087_v9 = vpop.eup %2086  ;;  %1993 = vmatpush3.msra.mxu1 %v589_v51  ;;  %1994 = vmatprep.mubr.msk.f32.mxu1 %vm2215_vm1, %v2214_v0 }
 0x35e   :  { %v1771_v31 = vmul.f32 %v2087_v9, %v2415_v46 }
 0x360   :  { %1995 = vmatmul.mubr.msk.f32.vlgmr.msra.gmra.mrb[26].mxu1 %vm668_vm3, %v1771_v31 }
 0x417   :  { %v749_v10 = vpop.f32.mrb[12].mxu1 }
 0x418   :  { %753 = vst [vmem:[#allocation10] sm:$0xff] %v749_v10  ;;  %v1926_v11 = vpop.f32.mrb[13].mxu1 }
 0x41b   :  { %v905_v12 = vpop.f32.mrb[14].mxu1 }
 0x41c   :  { %909 = vst [vmem:[#allocation10 + $0x8] sm:$0xff] %v905_v12  ;;  %v1936_v13 = vpop.f32.mrb[15].mxu1 }
 0x41f   :  { %v1061_v14 = vpop.f32.mrb[16].mxu1 }
 0x420   :  { %1065 = vst [vmem:[#allocation10 + $0x10] sm:$0xff] %v1061_v14  ;;  %v1946_v15 = vpop.f32.mrb[17].mxu1 }
 0x423   :  { %v1217_v16 = vpop.f32.mrb[18].mxu1 }
 0x424   :  { %1221 = vst [vmem:[#allocation10 + $0x18] sm:$0xff] %v1217_v16  ;;  %v1956_v17 = vpop.f32.mrb[19].mxu1 }
 0x427   :  { %v1373_v18 = vpop.f32.mrb[20].mxu1 }
 0x428   :  { %1377 = vst [vmem:[#allocation10 + $0x20] sm:$0xff] %v1373_v18  ;;  %v1966_v19 = vpop.f32.mrb[21].mxu1 }
 0x42b   :  { %v1529_v0 = vpop.f32.mrb[22].mxu1 }
 0x42c   :  { %1533 = vst [vmem:[#allocation10 + $0x28] sm:$0xff] %v1529_v0  ;;  %v1976_v20 = vpop.f32.mrb[23].mxu1 }
 0x42f   :  { %v1685_v21 = vpop.f32.mrb[24].mxu1 }
 0x430   :  { %1689 = vst [vmem:[#allocation10 + $0x30] sm:$0xff] %v1685_v21  ;;  %v1986_v22 = vpop.f32.mrb[25].mxu1 }
 0x433   :  { %v1841_v23 = vpop.f32.mrb[26].mxu1 }
 0x434   :  { %1845 = vst [vmem:[#allocation10 + $0x38] sm:$0xff] %v1841_v23  ;;  %v1996_v24 = vpop.f32.mrb[27].mxu1 }
 0x435   :  { %2187 = shalt.err (!%p2184_p8)
}
 0x436   :  { %s2188_s17 = scalar_lea.hbm %s2470_s4, 1024 }
 0x437   :  { %p2189_p9 = scmp.ne.s32.totalorder %s2470_s4, %s2188_s17  ;;  %p2192_p10 = scmp.lt.u32.totalorder %s2188_s17, %s2470_s4 }
 0x439   :  { %p2194_p11 = pnand %p2192_p10, %p2189_p9 }
 0x43b   :  { %2197 = shalt.err (!%p2194_p11)
}
 0x43c   :  { %1857 = dma.vmem_to_hbm [thread:$0]  %s1852_s13, 1024, %s2470_s4, [#allocation4], %s2207_s25, %s2207_s25, %s2208_s26  }
 0x43d   :  { %2204 = dma.done.wait [#allocation4], 1024  }
 0x43e   :  { %2205 = vsyncadd [#allocation4], 4294966272 }
 0x43f   :  { %1861 = vsyncpa [#allocation3], 1 }
 0x440   :  { %1862 = vsyncpa [#allocation6], 1 }
 0x441   :  { %1863 = vsyncpa [#allocation9], 1 }
 0x442   :  { %1864 = vsyncpa [#allocation4], 1 }

</bundles_post_ra>
